<compile_context>
chip_gen: v7x
topology: tpu7x:2x2x1
jax: 0.10.0
libtpu: 0.0.40
codegen_flags: <defaults>
</compile_context>

<pallas_src>
import math

import jax
import jax.numpy as jnp
from jax.experimental import pallas as pl
from jax.experimental.pallas import tpu as pltpu


def _round_up(a: int, b: int) -> int:
    return (a + b - 1) // b * b


def gcn_kernel(x_ref, w_ref, adj_ref, o_ref, support_ref):
    """Fused GCN forward, row-tiled over the adjacency.

    x_ref:       (N_pad, F_in_pad)   resident (constant index_map)
    w_ref:       (F_in_pad, F_out_pad) resident
    adj_ref:     (TM, N_pad)         streamed row tile of adj
    o_ref:       (TM, F_out_pad)     output row tile
    support_ref: (N_pad, F_out_pad)  persistent VMEM scratch (bf16)
    """
    # First grid step: compute support = x @ w once; the scratch persists
    # across the (sequential) row-tile grid, so later steps just reuse it.
    @pl.when(pl.program_id(0) == 0)
    def _():
        support_ref[...] = jnp.dot(
            x_ref[...], w_ref[...], preferred_element_type=jnp.float32
        ).astype(support_ref.dtype)

    # Row tile of the aggregation matmul: out[tile] = adj[tile, :] @ support.
    o_ref[...] = jnp.dot(
        adj_ref[...], support_ref[...], preferred_element_type=jnp.float32
    ).astype(o_ref.dtype)


def graph_convolution(x, adj, weight, *, block_rows=256,
                      compute_dtype=jnp.bfloat16):
    """Pallas GCN layer forward: out = adj @ (x @ weight).

    x:      [N, F_in]   node features
    adj:    [N, N]      dense adjacency
    weight: [F_in, F_out]
    returns [N, F_out]  in x.dtype
    """
    n, f_in = x.shape
    f_out = weight.shape[1]
    assert adj.shape == (n, n)
    assert weight.shape[0] == f_in
    out_dtype = x.dtype

    # --- Lane / MXU aligned padded shapes ------------------------------------
    block_rows = max(128, _round_up(block_rows, 128))
    tm = min(block_rows, _round_up(n, 128))   # row tile, multiple of 128
    n_p = _round_up(n, tm)                    # multiple of tm (hence of 128)
    fi_p = _round_up(f_in, 128)
    fo_p = _round_up(f_out, 128)
    num_tiles = n_p // tm

    # Zero padding keeps the math exact: padded adj columns and padded x rows
    # are zero, so they contribute nothing to the result.
    cd = jnp.dtype(compute_dtype)
    x_p = jnp.pad(x.astype(cd), ((0, n_p - n), (0, fi_p - f_in)))
    w_p = jnp.pad(weight.astype(cd), ((0, fi_p - f_in), (0, fo_p - f_out)))
    adj_p = jnp.pad(adj.astype(cd), ((0, n_p - n), (0, n_p - n)))

    c_item = cd.itemsize
    o_item = jnp.dtype(out_dtype).itemsize

    # VMEM budget: double-buffered adj row tiles + resident x/w + support
    # scratch + double-buffered output tiles, plus headroom.
    vmem_est = (2 * tm * n_p * c_item          # adj tiles (double-buffered)
                + 2 * n_p * fi_p * c_item      # x
                + 2 * fi_p * fo_p * c_item     # w
                + n_p * fo_p * c_item          # support scratch
                + 2 * tm * fo_p * o_item)      # output tiles
    vmem_limit = min(int(vmem_est * 1.5) + (8 << 20), 128 << 20)

    cost = pl.CostEstimate(
        flops=2 * n_p * fi_p * fo_p + 2 * n_p * n_p * fo_p,
        transcendentals=0,
        bytes_accessed=(n_p * fi_p + fi_p * fo_p + n_p * n_p) * c_item
        + n_p * fo_p * o_item,
    )

    out_p = pl.pallas_call(
        gcn_kernel,
        out_shape=jax.ShapeDtypeStruct((n_p, fo_p), out_dtype),
        grid_spec=pltpu.PrefetchScalarGridSpec(
            num_scalar_prefetch=0,
            grid=(num_tiles,),
            in_specs=[
                # x and w: full arrays with constant index_map -> stay resident.
                pl.BlockSpec((n_p, fi_p), lambda i: (0, 0)),
                pl.BlockSpec((fi_p, fo_p), lambda i: (0, 0)),
                # adj: streamed (TM, N_pad) row tiles -- the O(N^2) term.
                pl.BlockSpec((tm, n_p), lambda i: (i, 0)),
            ],
            out_specs=pl.BlockSpec((tm, fo_p), lambda i: (i, 0)),
            scratch_shapes=[pltpu.VMEM((n_p, fo_p), cd)],
        ),
        compiler_params=pltpu.CompilerParams(
            # The support scratch is filled at step 0 and reused afterwards,
            # so the row-tile axis must stay sequential.
            dimension_semantics=("arbitrary",),
            vmem_limit_bytes=vmem_limit,
        ),
        cost_estimate=cost,
    )(x_p, w_p, adj_p)

    # Slice padding off.
    return out_p[:n, :f_out]


if __name__ == "__main__":
    key = jax.random.PRNGKey(0)

    def make_case(k, n, f_in, f_out):
        k_x, k_adj, k_w = jax.random.split(k, 3)
        # Mirror reset_parameters(): stdv = 1/sqrt(out_features), U(-stdv, stdv).
        stdv = 1.0 / math.sqrt(f_out)
        weight = jax.random.uniform(
            k_w, (f_in, f_out), dtype=jnp.float32, minval=-stdv, maxval=stdv
        )
        x = jax.random.normal(k_x, (n, f_in), dtype=jnp.float32)
        adj_raw = jax.random.uniform(k_adj, (n, n), dtype=jnp.float32)
        adj = adj_raw / jnp.sum(adj_raw, axis=-1, keepdims=True)
        return x, adj, weight

    def ref_bf16(x, adj, w):
        # Same bf16-operand / f32-accumulation pipeline as the kernel.
        xb, ab, wb = (t.astype(jnp.bfloat16) for t in (x, adj, w))
        s = jnp.dot(xb, wb, preferred_element_type=jnp.float32).astype(jnp.bfloat16)
        return jnp.dot(ab, s, preferred_element_type=jnp.float32).astype(x.dtype)

    # Small shapes; the second case is deliberately unaligned (300, 48, 96) and
    # spans two row tiles to exercise padding + the persistent support scratch.
    cases = [(16, 32, 64), (300, 48, 96)]

    k = key
    for (n, f_in, f_out) in cases:
        k, sub = jax.random.split(k)
        x, adj, w = make_case(sub, n, f_in, f_out)

        out = jax.block_until_ready(graph_convolution(x, adj, w, block_rows=256))
        assert out.shape == (n, f_out)

        # Tight check against a JAX reference using the same bf16 numerics.
        ref_b = ref_bf16(x, adj, w)
        assert jnp.allclose(out, ref_b, atol=1e-3, rtol=1e-3), (n, f_in, f_out)

        # Loose check against the full-f32 reference (bf16 operand tolerance).
        ref32 = adj @ (x @ w)
        assert jnp.allclose(out, ref32, atol=3e-3, rtol=3e-2), (n, f_in, f_out)

    print("KERNEL_OK")
</pallas_src>

<mosaic_0001>
module attributes {stable_mosaic.version = 11 : i64} {
  func.func @gcn_kernel(%arg0: i32, %arg1: memref<128x128xbf16, #tpu.memory_space<vmem>>, %arg2: memref<128x128xbf16, #tpu.memory_space<vmem>>, %arg3: memref<128x128xbf16, #tpu.memory_space<vmem>>, %arg4: memref<128x128xf32, #tpu.memory_space<vmem>>, %arg5: memref<128x128xbf16, #tpu.memory_space<vmem>>) attributes {dimension_semantics = [#tpu.dimension_semantics<arbitrary>], iteration_bounds = array<i64: 1>, scalar_prefetch = 0 : i64, scratch_operands = 1 : i64, tpu.core_type = #tpu.core_type<tc>, window_params = [{pipeline_mode = #tpu.pipeline_mode<synchronous>, transform_indices = @transform_0, window_bounds = array<i64: 128, 128>}, {pipeline_mode = #tpu.pipeline_mode<synchronous>, transform_indices = @transform_1, window_bounds = array<i64: 128, 128>}, {transform_indices = @transform_2, window_bounds = array<i64: 128, 128>}, {transform_indices = @transform_3, window_bounds = array<i64: 128, 128>}]} {
    %c0_i32 = arith.constant 0 : i32
    %0 = arith.cmpi eq, %arg0, %c0_i32 : i32
    %1 = arith.extui %0 : i1 to i32
    %c0_i32_0 = arith.constant 0 : i32
    %2 = arith.cmpi ne, %1, %c0_i32_0 : i32
    scf.if %2 {
      %c0_6 = arith.constant 0 : index
      %c0_7 = arith.constant 0 : index
      %7 = vector.load %arg1[%c0_6, %c0_7] : memref<128x128xbf16, #tpu.memory_space<vmem>>, vector<128x128xbf16>
      %c0_8 = arith.constant 0 : index
      %c0_9 = arith.constant 0 : index
      %8 = vector.load %arg2[%c0_8, %c0_9] : memref<128x128xbf16, #tpu.memory_space<vmem>>, vector<128x128xbf16>
      %cst_10 = arith.constant dense<0.000000e+00> : vector<128x128xf32>
      %9 = tpu.matmul %7, %8, %cst_10 {dimension_numbers = #tpu.dot_dimension_numbers<[1], [0], [0], [1], [0, 0, 1, 1], [], []>} : vector<128x128xbf16>, vector<128x128xbf16>, vector<128x128xf32> -> vector<128x128xf32>
      %10 = arith.truncf %9 : vector<128x128xf32> to vector<128x128xbf16>
      %c0_11 = arith.constant 0 : index
      %c0_12 = arith.constant 0 : index
      %11 = vector.load %arg5[%c0_11, %c0_12] : memref<128x128xbf16, #tpu.memory_space<vmem>>, vector<128x128xbf16>
      tpu.vector_store %arg5[%c0_11, %c0_12], %10 {strides = array<i32>} : memref<128x128xbf16, #tpu.memory_space<vmem>>, vector<128x128xbf16>,
    } else {
    }
    %c0 = arith.constant 0 : index
    %c0_1 = arith.constant 0 : index
    %3 = vector.load %arg3[%c0, %c0_1] : memref<128x128xbf16, #tpu.memory_space<vmem>>, vector<128x128xbf16>
    %c0_2 = arith.constant 0 : index
    %c0_3 = arith.constant 0 : index
    %4 = vector.load %arg5[%c0_2, %c0_3] : memref<128x128xbf16, #tpu.memory_space<vmem>>, vector<128x128xbf16>
    %cst = arith.constant dense<0.000000e+00> : vector<128x128xf32>
    %5 = tpu.matmul %3, %4, %cst {dimension_numbers = #tpu.dot_dimension_numbers<[1], [0], [0], [1], [0, 0, 1, 1], [], []>} : vector<128x128xbf16>, vector<128x128xbf16>, vector<128x128xf32> -> vector<128x128xf32>
    %c0_4 = arith.constant 0 : index
    %c0_5 = arith.constant 0 : index
    %6 = vector.load %arg4[%c0_4, %c0_5] : memref<128x128xf32, #tpu.memory_space<vmem>>, vector<128x128xf32>
    tpu.vector_store %arg4[%c0_4, %c0_5], %5 {strides = array<i32>} : memref<128x128xf32, #tpu.memory_space<vmem>>, vector<128x128xf32>,
    return
  }
  func.func @transform_0(%arg0: i32) -> (i32, i32) {
    %c0_i32 = arith.constant 0 : i32
    %c0_i32_0 = arith.constant 0 : i32
    %c0_i32_1 = arith.constant 0 : i32
    return %c0_i32, %c0_i32_0 : i32, i32
  }
  func.func @transform_1(%arg0: i32) -> (i32, i32) {
    %c0_i32 = arith.constant 0 : i32
    %c0_i32_0 = arith.constant 0 : i32
    %c0_i32_1 = arith.constant 0 : i32
    return %c0_i32, %c0_i32_0 : i32, i32
  }
  func.func @transform_2(%arg0: i32) -> (i32, i32) {
    %c0_i32 = arith.constant 0 : i32
    %c0_i32_0 = arith.constant 0 : i32
    return %arg0, %c0_i32 : i32, i32
  }
  func.func @transform_3(%arg0: i32) -> (i32, i32) {
    %c0_i32 = arith.constant 0 : i32
    %c0_i32_0 = arith.constant 0 : i32
    return %arg0, %c0_i32 : i32, i32
  }
}

</mosaic_0001>

<bundles_post_ra>
// kernel: tpu_custom_call.1
= control target key start
LH: loop header
LB: loop body
LE: loop exit
PB: predicated region body
PF: predicated region fallthrough
CT: control target
= control target key end

     0   :  { %8 = vsyncpa [#allocation4], 0  ;;  %s843_s0 = inlined_call_operand.hbm [shape: bf16[128,128], index: 0, kind: input, shape index: {}]   ;;  %s844_s1 = inlined_call_operand.hbm [shape: bf16[128,128], index: 1, kind: input, shape index: {}]   ;;  %s845_s2 = inlined_call_operand.hbm [shape: bf16[128,128], index: 2, kind: input, shape index: {}]   ;;  %s846_s3 = inlined_call_operand.hbm [shape: f32[128,128], index: 3, kind: output, shape index: {}]  }
   0x1   :  { %9 = vsyncpa [#allocation7], 0 }
   0x2   :  { %10 = vsyncpa [#allocation5], 0  ;;  %s751_s12 = smov [#allocation6]   ;;  %s752_s14 = smov [#allocation3]  }
   0x3   :  { %s28_s13 = sshll.u32 %s751_s12, 4  ;;  %s16_s15 = sshll.u32 %s752_s14, 4  ;;  %s29_s13 = int_to_ptr.vmem [resolvable:$true] %s28_s13  ;;  %s779_s15 = int_to_ptr.vmem [resolvable:$true] %s16_s15 }
   0x4   :  { %s657_s18 = scalar_lea.hbm %s844_s1, 1024 }
   0x5   :  { %p658_p0 = scmp.ne.s32.totalorder %s844_s1, %s657_s18  ;;  %p661_p1 = scmp.lt.u32.totalorder %s657_s18, %s844_s1 }
   0x7   :  { %p663_p2 = pnand %p661_p1, %p658_p0 }
   0x9   :  { %666 = shalt.err (!%p663_p2)
}
   0xa   :  { %s667_s23 = scalar_lea.vmem %s29_s13, 1024  ;;  %p672_p4 = scmp.lt.s32.totalorder %s29_s13, %s29_s13 }
   0xb   :  { %p668_p3 = scmp.ne.s32.totalorder %s29_s13, %s667_s23  ;;  %p673_p5 = scmp.lt.s32.totalorder %s667_s23, %s667_s23 }
   0xd   :  { %p674_p6 = por %p673_p5, %p672_p4 }
   0xf   :  { %p675_p7 = pnand %p674_p6, %p668_p3 }
  0x11   :  { %678 = shalt.err (!%p675_p7)
}
  0x12   :  { %s753_s24 = smov 64   ;;  %s754_s25 = smov 4  }
  0x13   :  { %34 = dma.hbm_to_vmem [thread:$0]  %s844_s1, 1024, %s29_s13, [#allocation7], %s753_s24, %s753_s24, %s754_s25  }
  0x14   :  { %s679_s30 = scalar_lea.hbm %s843_s0, 1024 }
  0x15   :  { %p680_p8 = scmp.ne.s32.totalorder %s843_s0, %s679_s30  ;;  %p683_p9 = scmp.lt.u32.totalorder %s679_s30, %s843_s0 }
  0x17   :  { %p685_p10 = pnand %p683_p9, %p680_p8 }
  0x19   :  { %688 = shalt.err (!%p685_p10)
}
  0x1a   :  { %s689_s8 = scalar_lea.vmem %s779_s15, 1024  ;;  %p694_p12 = scmp.lt.s32.totalorder %s779_s15, %s779_s15 }
  0x1b   :  { %p690_p11 = scmp.ne.s32.totalorder %s779_s15, %s689_s8  ;;  %p695_p13 = scmp.lt.s32.totalorder %s689_s8, %s689_s8 }
  0x1d   :  { %p696_p0 = por %p695_p13, %p694_p12 }
  0x1f   :  { %p697_p1 = pnand %p696_p0, %p690_p11 }
  0x21   :  { %700 = shalt.err (!%p697_p1)
}
  0x22   :  { %22 = dma.hbm_to_vmem [thread:$0]  %s843_s0, 1024, %s779_s15, [#allocation4], %s753_s24, %s753_s24, %s754_s25  }
  0x23   :  { %s755_s10 = smov [#allocation8]   ;;  %s701_s14 = scalar_lea.hbm %s845_s2, 1024 }
  0x24   :  { %s40_s11 = sshll.u32 %s755_s10, 4  ;;  %p702_p2 = scmp.ne.s32.totalorder %s845_s2, %s701_s14  ;;  %s41_s11 = int_to_ptr.vmem [resolvable:$true] %s40_s11 }
  0x25   :  { %p705_p3 = scmp.lt.u32.totalorder %s701_s14, %s845_s2 }
  0x27   :  { %p707_p4 = pnand %p705_p3, %p702_p2 }
  0x29   :  { %710 = shalt.err (!%p707_p4)
}
  0x2a   :  { %s711_s20 = scalar_lea.vmem %s41_s11, 1024  ;;  %p716_p6 = scmp.lt.s32.totalorder %s41_s11, %s41_s11 }
  0x2b   :  { %p712_p5 = scmp.ne.s32.totalorder %s41_s11, %s711_s20  ;;  %p717_p7 = scmp.lt.s32.totalorder %s711_s20, %s711_s20 }
  0x2d   :  { %p718_p8 = por %p717_p7, %p716_p6 }
  0x2f   :  { %p719_p9 = pnand %p718_p8, %p712_p5 }
  0x31   :  { %722 = shalt.err (!%p719_p9)
}
  0x32   :  { %46 = dma.hbm_to_vmem [thread:$0]  %s845_s2, 1024, %s41_s11, [#allocation7], %s753_s24, %s753_s24, %s754_s25  }
  0x33   :  { %745 = dma.done.wait [#allocation4], 1024  }
  0x34   :  { %746 = vsyncadd [#allocation4], 4294966272 }
  0x35   :  { %747 = dma.done.wait [#allocation7], 2048  }
  0x36   :  { %748 = vsyncadd [#allocation7], 4294965248  ;;  %v633_v0 = vld [vmem:[#allocation6] sm:$0xff]   ;;  %v634_v1 = vld [vmem:[#allocation6 + $0x8] sm:$0xff]   ;;  %s756_s2 = smov [#allocation9]  }
  0x37   :  { %561 = vmatprep.subr.bf16.mxu0 %v633_v0  ;;  %v635_v2 = vld [vmem:[#allocation6 + $0x10] sm:$0xff]   ;;  %v636_v3 = vld [vmem:[#allocation6 + $0x18] sm:$0xff]   ;;  %v641_v4 = vld [vmem:[#allocation3] sm:$0xff]   ;;  %s492_s21 = sshll.u32 %s756_s2, 4  ;;  %s493_s21 = int_to_ptr.vmem [resolvable:$true] %s492_s21 }
  0x38   :  { %562 = vmatpush3.bf16.msra.mxu0 %v633_v0  ;;  %577 = vmatprep.mubr.bf16.mxu0 %v641_v4  ;;  %v637_v5 = vld [vmem:[#allocation6 + $0x20] sm:$0xff]   ;;  %v638_v6 = vld [vmem:[#allocation6 + $0x28] sm:$0xff]   ;;  %v639_v7 = vld [vmem:[#allocation6 + $0x30] sm:$0xff]   ;;  %s723_s22 = scalar_lea.vmem %s493_s21, 2048  ;;  %p728_p11 = scmp.lt.s32.totalorder %s493_s21, %s493_s21 }
  0x39   :  { %563 = vmatprep.subr.bf16.mxu0 %v634_v1  ;;  %v640_v8 = vld [vmem:[#allocation6 + $0x38] sm:$0xff]   ;;  %v642_v9 = vld [vmem:[#allocation3 + $0x8] sm:$0xff]   ;;  %v643_v10 = vld [vmem:[#allocation3 + $0x10] sm:$0xff]   ;;  %p724_p10 = scmp.ne.s32.totalorder %s493_s21, %s723_s22  ;;  %p729_p12 = scmp.lt.s32.totalorder %s723_s22, %s723_s22 }
  0x3a   :  { %v644_v11 = vld [vmem:[#allocation3 + $0x18] sm:$0xff]   ;;  %v645_v12 = vld [vmem:[#allocation3 + $0x20] sm:$0xff]   ;;  %v646_v13 = vld [vmem:[#allocation3 + $0x28] sm:$0xff]  }
  0x3b   :  { %v647_v14 = vld [vmem:[#allocation3 + $0x30] sm:$0xff]   ;;  %v648_v15 = vld [vmem:[#allocation3 + $0x38] sm:$0xff]   ;;  %v649_v16 = vld [vmem:[#allocation8] sm:$0xff]   ;;  %p730_p13 = por %p729_p12, %p728_p11 }
  0x3c   :  { %564 = vmatpush3.bf16.msra.mxu0 %v634_v1  ;;  %609 = vmatprep.mubr.bf16.mxu1 %v649_v16  ;;  %v650_v41 = vld [vmem:[#allocation8 + $0x8] sm:$0xff]   ;;  %v651_v42 = vld [vmem:[#allocation8 + $0x10] sm:$0xff]   ;;  %v652_v43 = vld [vmem:[#allocation8 + $0x18] sm:$0xff]  }
  0x3d   :  { %565 = vmatprep.subr.bf16.mxu0 %v635_v2  ;;  %v653_v44 = vld [vmem:[#allocation8 + $0x20] sm:$0xff]   ;;  %v654_v45 = vld [vmem:[#allocation8 + $0x28] sm:$0xff]   ;;  %v655_v46 = vld [vmem:[#allocation8 + $0x30] sm:$0xff]   ;;  %p731_p0 = pnand %p730_p13, %p724_p10 }
  0x3e   :  { %v656_v47 = vld [vmem:[#allocation8 + $0x38] sm:$0xff]  }
  0x40   :  { %566 = vmatpush3.bf16.msra.mxu0 %v635_v2 }
  0x41   :  { %567 = vmatprep.subr.bf16.mxu0 %v636_v3 }
  0x44   :  { %568 = vmatpush3.bf16.msra.mxu0 %v636_v3 }
  0x45   :  { %569 = vmatprep.subr.bf16.mxu0 %v637_v5 }
  0x48   :  { %570 = vmatpush3.bf16.msra.mxu0 %v637_v5 }
  0x49   :  { %571 = vmatprep.subr.bf16.mxu0 %v638_v6 }
  0x4c   :  { %572 = vmatpush3.bf16.msra.mxu0 %v638_v6 }
  0x4d   :  { %573 = vmatprep.subr.bf16.mxu0 %v639_v7 }
  0x50   :  { %574 = vmatpush3.bf16.msra.mxu0 %v639_v7 }
  0x51   :  { %575 = vmatprep.subr.bf16.mxu0 %v640_v8 }
  0x54   :  { %576 = vmatpush3.bf16.msra.mxu0 %v640_v8 }
  0x57   :  { %578 = vmatmul.mubr.bf16.vlgmr.msra.gmra.mrb[0].mxu0 %v642_v9 }
  0x58   :  { %581 = vmatprep.mubr.bf16.mxu0 %v643_v10 }
  0x5f   :  { %582 = vmatmul.mubr.bf16.gmra.mrb[4].mxu0 %v644_v11 }
  0x60   :  { %585 = vmatprep.mubr.bf16.mxu0 %v645_v12 }
  0x67   :  { %586 = vmatmul.mubr.bf16.gmra.mrb[8].mxu0 %v646_v13 }
  0x68   :  { %589 = vmatprep.mubr.bf16.mxu0 %v647_v14 }
  0x6f   :  { %590 = vmatmul.mubr.bf16.gmra.mrb[12].mxu0 %v648_v15 }
 0x12a   :  { %v579_v17 = vpop.f32.mrb[0].mxu0 }
 0x12b   :  { %v223_v18 = vpop.f32.mrb[1].mxu0 }
 0x12c   :  { %v580_v19 = vpop.f32.mrb[2].mxu0 }
 0x12d   :  { %v287_v20 = vpack.c.bf16 %v580_v19, %v579_v17  ;;  %v226_v21 = vpop.f32.mrb[3].mxu0 }
 0x12e   :  { %v286_v22 = vpack.c.bf16 %v226_v21, %v223_v18 }
 0x130   :  { %593 = vmatprep.subr.bf16.mxu1 %v286_v22 }
 0x131   :  { %594 = vmatpush3.bf16.msra.mxu1 %v286_v22 }
 0x132   :  { %v583_v23 = vpop.f32.mrb[4].mxu0  ;;  %595 = vmatprep.subr.bf16.mxu1 %v287_v20 }
 0x133   :  { %v239_v24 = vpop.f32.mrb[5].mxu0 }
 0x134   :  { %v584_v25 = vpop.f32.mrb[6].mxu0 }
 0x135   :  { %v289_v26 = vpack.c.bf16 %v584_v25, %v583_v23  ;;  %v242_v27 = vpop.f32.mrb[7].mxu0  ;;  %596 = vmatpush3.bf16.msra.mxu1 %v287_v20 }
 0x136   :  { %v288_v28 = vpack.c.bf16 %v242_v27, %v239_v24 }
 0x138   :  { %597 = vmatprep.subr.bf16.mxu1 %v288_v28 }
 0x139   :  { %598 = vmatpush3.bf16.msra.mxu1 %v288_v28 }
 0x13a   :  { %v587_v29 = vpop.f32.mrb[8].mxu0  ;;  %599 = vmatprep.subr.bf16.mxu1 %v289_v26 }
 0x13b   :  { %v255_v30 = vpop.f32.mrb[9].mxu0 }
 0x13c   :  { %v588_v31 = vpop.f32.mrb[10].mxu0 }
 0x13d   :  { %v291_v32 = vpack.c.bf16 %v588_v31, %v587_v29  ;;  %v258_v33 = vpop.f32.mrb[11].mxu0  ;;  %600 = vmatpush3.bf16.msra.mxu1 %v289_v26 }
 0x13e   :  { %v290_v34 = vpack.c.bf16 %v258_v33, %v255_v30 }
 0x140   :  { %601 = vmatprep.subr.bf16.mxu1 %v290_v34 }
 0x141   :  { %602 = vmatpush3.bf16.msra.mxu1 %v290_v34 }
 0x142   :  { %v591_v35 = vpop.f32.mrb[12].mxu0  ;;  %603 = vmatprep.subr.bf16.mxu1 %v291_v32 }
 0x143   :  { %v271_v36 = vpop.f32.mrb[13].mxu0 }
 0x144   :  { %v592_v37 = vpop.f32.mrb[14].mxu0 }
 0x145   :  { %v293_v38 = vpack.c.bf16 %v592_v37, %v591_v35  ;;  %v274_v39 = vpop.f32.mrb[15].mxu0  ;;  %604 = vmatpush3.bf16.msra.mxu1 %v291_v32 }
 0x146   :  { %v292_v40 = vpack.c.bf16 %v274_v39, %v271_v36 }
 0x148   :  { %605 = vmatprep.subr.bf16.mxu1 %v292_v40 }
 0x149   :  { %606 = vmatpush3.bf16.msra.mxu1 %v292_v40 }
 0x14a   :  { %607 = vmatprep.subr.bf16.mxu1 %v293_v38 }
 0x14d   :  { %608 = vmatpush3.bf16.msra.mxu1 %v293_v38 }
 0x150   :  { %610 = vmatmul.mubr.bf16.vlgmr.msra.gmra.mrb[0].mxu1 %v650_v41 }
 0x151   :  { %613 = vmatprep.mubr.bf16.mxu1 %v651_v42 }
 0x158   :  { %614 = vmatmul.mubr.bf16.gmra.mrb[4].mxu1 %v652_v43 }
 0x159   :  { %617 = vmatprep.mubr.bf16.mxu1 %v653_v44 }
 0x160   :  { %618 = vmatmul.mubr.bf16.gmra.mrb[8].mxu1 %v654_v45 }
 0x161   :  { %621 = vmatprep.mubr.bf16.mxu1 %v655_v46 }
 0x168   :  { %622 = vmatmul.mubr.bf16.gmra.mrb[12].mxu1 %v656_v47 }
 0x223   :  { %v611_v48 = vpop.f32.mrb[0].mxu1 }
 0x224   :  { %473 = vst [vmem:[#allocation9 + $0x10] sm:$0xff] %v611_v48  ;;  %v408_v49 = vpop.f32.mrb[1].mxu1 }
 0x225   :  { %471 = vst [vmem:[#allocation9] sm:$0xff] %v408_v49  ;;  %v612_v50 = vpop.f32.mrb[2].mxu1 }
 0x226   :  { %474 = vst [vmem:[#allocation9 + $0x18] sm:$0xff] %v612_v50  ;;  %v411_v51 = vpop.f32.mrb[3].mxu1 }
 0x227   :  { %472 = vst [vmem:[#allocation9 + $0x8] sm:$0xff] %v411_v51 }
 0x22b   :  { %v615_v52 = vpop.f32.mrb[4].mxu1 }
 0x22c   :  { %477 = vst [vmem:[#allocation9 + $0x30] sm:$0xff] %v615_v52  ;;  %v424_v53 = vpop.f32.mrb[5].mxu1 }
 0x22d   :  { %475 = vst [vmem:[#allocation9 + $0x20] sm:$0xff] %v424_v53  ;;  %v616_v54 = vpop.f32.mrb[6].mxu1 }
 0x22e   :  { %478 = vst [vmem:[#allocation9 + $0x38] sm:$0xff] %v616_v54  ;;  %v427_v55 = vpop.f32.mrb[7].mxu1 }
 0x22f   :  { %476 = vst [vmem:[#allocation9 + $0x28] sm:$0xff] %v427_v55 }
 0x233   :  { %v619_v56 = vpop.f32.mrb[8].mxu1 }
 0x234   :  { %481 = vst [vmem:[#allocation9 + $0x50] sm:$0xff] %v619_v56  ;;  %v440_v57 = vpop.f32.mrb[9].mxu1 }
 0x235   :  { %479 = vst [vmem:[#allocation9 + $0x40] sm:$0xff] %v440_v57  ;;  %v620_v58 = vpop.f32.mrb[10].mxu1 }
 0x236   :  { %482 = vst [vmem:[#allocation9 + $0x58] sm:$0xff] %v620_v58  ;;  %v443_v59 = vpop.f32.mrb[11].mxu1 }
 0x237   :  { %480 = vst [vmem:[#allocation9 + $0x48] sm:$0xff] %v443_v59 }
 0x23b   :  { %v623_v60 = vpop.f32.mrb[12].mxu1 }
 0x23c   :  { %485 = vst [vmem:[#allocation9 + $0x70] sm:$0xff] %v623_v60  ;;  %v456_v61 = vpop.f32.mrb[13].mxu1 }
 0x23d   :  { %483 = vst [vmem:[#allocation9 + $0x60] sm:$0xff] %v456_v61  ;;  %v624_v62 = vpop.f32.mrb[14].mxu1 }
 0x23e   :  { %486 = vst [vmem:[#allocation9 + $0x78] sm:$0xff] %v624_v62  ;;  %v459_v63 = vpop.f32.mrb[15].mxu1 }
 0x23f   :  { %484 = vst [vmem:[#allocation9 + $0x68] sm:$0xff] %v459_v63 }
 0x240   :  { %734 = shalt.err (!%p731_p0)
}
 0x241   :  { %s735_s25 = scalar_lea.hbm %s846_s3, 2048 }
 0x242   :  { %p736_p1 = scmp.ne.s32.totalorder %s846_s3, %s735_s25  ;;  %p739_p2 = scmp.lt.u32.totalorder %s735_s25, %s846_s3 }
 0x244   :  { %p741_p3 = pnand %p739_p2, %p736_p1 }
 0x246   :  { %744 = shalt.err (!%p741_p3)
}
 0x247   :  { %s757_s30 = smov 128   ;;  %s758_s4 = smov 8  }
 0x248   :  { %498 = dma.vmem_to_hbm [thread:$0]  %s493_s21, 2048, %s846_s3, [#allocation5], %s757_s30, %s757_s30, %s758_s4  }
 0x249   :  { %749 = dma.done.wait [#allocation5], 2048  }
 0x24a   :  { %750 = vsyncadd [#allocation5], 4294965248 }
 0x24b   :  { %502 = vsyncpa [#allocation4], 1 }
 0x24c   :  { %503 = vsyncpa [#allocation7], 1 }
 0x24d   :  { %504 = vsyncpa [#allocation5], 1 }

</bundles_post_ra>
